<compile_context>
chip_gen: v5e
topology: v5e:2x2
jax: 0.10.0
libtpu: 0.0.40
codegen_flags: <defaults>
</compile_context>

<pallas_src>
import functools

import jax
import jax.numpy as jnp
from jax.experimental import pallas as pl
from jax.experimental.pallas import tpu as pltpu

EPS = 0.001  # matches nn.BatchNorm2d(nIn, eps=0.001)
_VMEM_LIMIT = 32 * 1024 * 1024       # safe on v5e/v6e/v7x
_TARGET_TILE_BYTES = 2 * 1024 * 1024  # per-input-tile budget (double-buffered)


def _stats_kernel(x_ref, sum_ref, sumsq_ref, *, hw, lc, needs_mask):
    """Accumulate per-channel sum / sum-of-squares over H*W chunks."""
    l = pl.program_id(1)

    @pl.when(l == 0)
    def _():
        sum_ref[...] = jnp.zeros_like(sum_ref)
        sumsq_ref[...] = jnp.zeros_like(sumsq_ref)

    x = x_ref[0].astype(jnp.float32)  # (C, Lc)
    if needs_mask:
        # Tail tile: zero out lanes beyond the real H*W extent so the sums
        # are not polluted by padding garbage.
        lane = jax.lax.broadcasted_iota(jnp.int32, x.shape, 1) + l * lc
        x = jnp.where(lane < hw, x, 0.0)

    sum_ref[0] = sum_ref[0] + jnp.sum(x, axis=1, keepdims=True)       # (C, 1)
    sumsq_ref[0] = sumsq_ref[0] + jnp.sum(x * x, axis=1, keepdims=True)


def _apply_kernel(x_ref, scale_ref, shift_ref, alpha_ref, o_ref):
    """y = x*scale + shift ; out = where(y>0, y, alpha*y)."""
    x = x_ref[0].astype(jnp.float32)                 # (C, Lc)
    y = x * scale_ref[...] + shift_ref[...]          # (C, 1) broadcast
    out = jnp.where(y > 0, y, alpha_ref[...] * y)
    o_ref[0] = out.astype(o_ref.dtype)


def bnprelu(x_nchw, gamma, beta, alpha):
    """Training-mode BatchNorm2d(eps=1e-3) followed by per-channel PReLU.

    x_nchw: (N, C, H, W); gamma, beta, alpha: (C,)
    """
    N, C, H, W = x_nchw.shape
    HW = H * W
    x3 = x_nchw.reshape(N, C, HW)  # free reshape — no transpose / extra HBM pass

    # Lane-chunk sizing: lane-dense (multiple of 128) and small enough that
    # double-buffered in + out tiles fit comfortably in scoped VMEM on all gens.
    itemsize = jnp.dtype(x_nchw.dtype).itemsize
    lc_cap = max(128, (_TARGET_TILE_BYTES // (C * itemsize)) // 128 * 128)
    if HW <= lc_cap:
        Lc, nL = HW, 1               # full-extent lane dim (always legal)
    else:
        Lc, nL = lc_cap, pl.cdiv(HW, lc_cap)
    needs_mask = (HW % Lc) != 0

    cparams_stats = pltpu.CompilerParams(
        dimension_semantics=("parallel", "arbitrary"),
        vmem_limit_bytes=_VMEM_LIMIT,
    )
    cparams_apply = pltpu.CompilerParams(
        dimension_semantics=("parallel", "parallel"),
        vmem_limit_bytes=_VMEM_LIMIT,
    )

    # ---- Pass 1: per-(image, channel) sum and sum-of-squares -------------
    stats_kernel = functools.partial(
        _stats_kernel, hw=HW, lc=Lc, needs_mask=needs_mask)
    sum_n, sumsq_n = pl.pallas_call(
        stats_kernel,
        out_shape=(
            jax.ShapeDtypeStruct((N, C, 1), jnp.float32),
            jax.ShapeDtypeStruct((N, C, 1), jnp.float32),
        ),
        grid=(N, nL),
        in_specs=[pl.BlockSpec((1, C, Lc), lambda n, l: (n, 0, l))],
        out_specs=(
            pl.BlockSpec((1, C, 1), lambda n, l: (n, 0, 0)),
            pl.BlockSpec((1, C, 1), lambda n, l: (n, 0, 0)),
        ),
        compiler_params=cparams_stats,
    )(x3)

    # ---- Tiny XLA epilogue on (C, 1): fold stats into scale/shift --------
    count = jnp.float32(N * HW)
    mean = jnp.sum(sum_n, axis=0) / count                       # (C, 1)
    var = jnp.maximum(jnp.sum(sumsq_n, axis=0) / count - mean * mean, 0.0)
    inv_std = jax.lax.rsqrt(var + EPS)
    scale = gamma.reshape(C, 1).astype(jnp.float32) * inv_std   # (C, 1)
    shift = beta.reshape(C, 1).astype(jnp.float32) - mean * scale
    alpha_c1 = alpha.reshape(C, 1).astype(jnp.float32)

    # ---- Pass 2: normalize + PReLU, streamed tile by tile -----------------
    out3 = pl.pallas_call(
        _apply_kernel,
        out_shape=jax.ShapeDtypeStruct((N, C, HW), x_nchw.dtype),
        grid=(N, nL),
        in_specs=[
            pl.BlockSpec((1, C, Lc), lambda n, l: (n, 0, l)),
            pl.BlockSpec((C, 1), lambda n, l: (0, 0)),
            pl.BlockSpec((C, 1), lambda n, l: (0, 0)),
            pl.BlockSpec((C, 1), lambda n, l: (0, 0)),
        ],
        out_specs=pl.BlockSpec((1, C, Lc), lambda n, l: (n, 0, l)),
        compiler_params=cparams_apply,
    )(x3, scale, shift, alpha_c1)

    return out3.reshape(N, C, H, W)


if __name__ == "__main__":
    key = jax.random.PRNGKey(0)
    N, C, H, W = 2, 4, 16, 16
    x = jax.random.normal(key, (N, C, H, W), dtype=jnp.float32)

    # Deterministic params matching the PyTorch module's __init__:
    # BatchNorm2d: weight=1, bias=0; PReLU(nIn): alpha=0.25 per channel.
    gamma = jnp.ones((C,), dtype=jnp.float32)
    beta = jnp.zeros((C,), dtype=jnp.float32)
    alpha = jnp.full((C,), 0.25, dtype=jnp.float32)

    out = bnprelu(x, gamma, beta, alpha)
    jax.block_until_ready(out)

    # Pure-JAX reference (training-mode BN + PReLU).
    mean = jnp.mean(x, axis=(0, 2, 3), keepdims=True)
    var = jnp.mean((x - mean) ** 2, axis=(0, 2, 3), keepdims=True)
    y = (x - mean) / jnp.sqrt(var + EPS)
    y = y * gamma.reshape(1, C, 1, 1) + beta.reshape(1, C, 1, 1)
    ref = jnp.where(y > 0, y, alpha.reshape(1, C, 1, 1) * y)
    assert jnp.allclose(out, ref, atol=1e-4, rtol=1e-4), "mismatch vs reference"

    print("KERNEL_OK")
</pallas_src>

<mosaic_0001>
module attributes {stable_mosaic.version = 11 : i64} {
  func.func @_stats_kernel(%arg0: i32, %arg1: i32, %arg2: memref<1x4x256xf32, #tpu.memory_space<vmem>>, %arg3: memref<1x4x1xf32, #tpu.memory_space<vmem>>, %arg4: memref<1x4x1xf32, #tpu.memory_space<vmem>>) attributes {dimension_semantics = [#tpu.dimension_semantics<parallel>, #tpu.dimension_semantics<arbitrary>], iteration_bounds = array<i64: 2, 1>, scalar_prefetch = 0 : i64, scratch_operands = 0 : i64, tpu.core_type = #tpu.core_type<tc>, window_params = [{transform_indices = @transform_0, window_bounds = array<i64: 1, 4, 256>}, {transform_indices = @transform_1, window_bounds = array<i64: 1, 4, 1>}, {transform_indices = @transform_2, window_bounds = array<i64: 1, 4, 1>}]} {
    %c0_i32 = arith.constant 0 : i32
    %0 = arith.cmpi eq, %arg1, %c0_i32 : i32
    %1 = arith.extui %0 : i1 to i32
    %c0_i32_0 = arith.constant 0 : i32
    %2 = arith.cmpi ne, %1, %c0_i32_0 : i32
    scf.if %2 {
      %cst_16 = arith.constant 0.000000e+00 : f32
      %22 = vector.broadcast %cst_16 : f32 to vector<1x4x1xf32>
      %c0_17 = arith.constant 0 : index
      %c0_18 = arith.constant 0 : index
      %c0_19 = arith.constant 0 : index
      %23 = vector.load %arg3[%c0_17, %c0_18, %c0_19] : memref<1x4x1xf32, #tpu.memory_space<vmem>>, vector<1x4x1xf32>
      tpu.vector_store %arg3[%c0_17, %c0_18, %c0_19], %22 {strides = array<i32>} : memref<1x4x1xf32, #tpu.memory_space<vmem>>, vector<1x4x1xf32>,
      %cst_20 = arith.constant 0.000000e+00 : f32
      %24 = vector.broadcast %cst_20 : f32 to vector<1x4x1xf32>
      %c0_21 = arith.constant 0 : index
      %c0_22 = arith.constant 0 : index
      %c0_23 = arith.constant 0 : index
      %25 = vector.load %arg4[%c0_21, %c0_22, %c0_23] : memref<1x4x1xf32, #tpu.memory_space<vmem>>, vector<1x4x1xf32>
      tpu.vector_store %arg4[%c0_21, %c0_22, %c0_23], %24 {strides = array<i32>} : memref<1x4x1xf32, #tpu.memory_space<vmem>>, vector<1x4x1xf32>,
    } else {
    }
    %c0 = arith.constant 0 : index
    %c0_1 = arith.constant 0 : index
    %c0_2 = arith.constant 0 : index
    %3 = vector.load %arg2[%c0, %c0_1, %c0_2] : memref<1x4x256xf32, #tpu.memory_space<vmem>>, vector<1x4x256xf32>
    %4 = vector.shape_cast %3 : vector<1x4x256xf32> to vector<4x256xf32>
    %c0_3 = arith.constant 0 : index
    %c0_4 = arith.constant 0 : index
    %c0_5 = arith.constant 0 : index
    %5 = vector.load %arg3[%c0_3, %c0_4, %c0_5] : memref<1x4x1xf32, #tpu.memory_space<vmem>>, vector<1x4x1xf32>
    %6 = vector.shape_cast %5 : vector<1x4x1xf32> to vector<4x1xf32>
    %cst = arith.constant dense<0.000000e+00> : vector<4xf32>
    %7 = vector.multi_reduction <add>, %4, %cst [1] : vector<4x256xf32> to vector<4xf32>
    %8 = vector.shape_cast %7 : vector<4xf32> to vector<4x1xf32>
    %9 = arith.addf %6, %8 : vector<4x1xf32>
    %c0_6 = arith.constant 0 : index
    %c0_7 = arith.constant 0 : index
    %c0_8 = arith.constant 0 : index
    %10 = vector.load %arg3[%c0_6, %c0_7, %c0_8] : memref<1x4x1xf32, #tpu.memory_space<vmem>>, vector<1x4x1xf32>
    %11 = vector.shape_cast %10 : vector<1x4x1xf32> to vector<4x1xf32>
    %12 = vector.shape_cast %9 : vector<4x1xf32> to vector<1x4x1xf32>
    tpu.vector_store %arg3[%c0_6, %c0_7, %c0_8], %12 {strides = array<i32>} : memref<1x4x1xf32, #tpu.memory_space<vmem>>, vector<1x4x1xf32>,
    %c0_9 = arith.constant 0 : index
    %c0_10 = arith.constant 0 : index
    %c0_11 = arith.constant 0 : index
    %13 = vector.load %arg4[%c0_9, %c0_10, %c0_11] : memref<1x4x1xf32, #tpu.memory_space<vmem>>, vector<1x4x1xf32>
    %14 = vector.shape_cast %13 : vector<1x4x1xf32> to vector<4x1xf32>
    %15 = arith.mulf %4, %4 : vector<4x256xf32>
    %cst_12 = arith.constant dense<0.000000e+00> : vector<4xf32>
    %16 = vector.multi_reduction <add>, %15, %cst_12 [1] : vector<4x256xf32> to vector<4xf32>
    %17 = vector.shape_cast %16 : vector<4xf32> to vector<4x1xf32>
    %18 = arith.addf %14, %17 : vector<4x1xf32>
    %c0_13 = arith.constant 0 : index
    %c0_14 = arith.constant 0 : index
    %c0_15 = arith.constant 0 : index
    %19 = vector.load %arg4[%c0_13, %c0_14, %c0_15] : memref<1x4x1xf32, #tpu.memory_space<vmem>>, vector<1x4x1xf32>
    %20 = vector.shape_cast %19 : vector<1x4x1xf32> to vector<4x1xf32>
    %21 = vector.shape_cast %18 : vector<4x1xf32> to vector<1x4x1xf32>
    tpu.vector_store %arg4[%c0_13, %c0_14, %c0_15], %21 {strides = array<i32>} : memref<1x4x1xf32, #tpu.memory_space<vmem>>, vector<1x4x1xf32>,
    return
  }
  func.func @transform_0(%arg0: i32, %arg1: i32) -> (i32, i32, i32) {
    %c0_i32 = arith.constant 0 : i32
    %c0_i32_0 = arith.constant 0 : i32
    return %arg0, %c0_i32, %arg1 : i32, i32, i32
  }
  func.func @transform_1(%arg0: i32, %arg1: i32) -> (i32, i32, i32) {
    %c0_i32 = arith.constant 0 : i32
    %c0_i32_0 = arith.constant 0 : i32
    %c0_i32_1 = arith.constant 0 : i32
    return %arg0, %c0_i32, %c0_i32_0 : i32, i32, i32
  }
  func.func @transform_2(%arg0: i32, %arg1: i32) -> (i32, i32, i32) {
    %c0_i32 = arith.constant 0 : i32
    %c0_i32_0 = arith.constant 0 : i32
    %c0_i32_1 = arith.constant 0 : i32
    return %arg0, %c0_i32, %c0_i32_0 : i32, i32, i32
  }
}

</mosaic_0001>

<bundles_post_ra>
// kernel: tpu_custom_call.1
= control target key start
LH: loop header
LB: loop body
LE: loop exit
PB: predicated region body
PF: predicated region fallthrough
CT: control target
= control target key end

     0   :  { %8 = vsyncpa [#allocation3], 0  ;;  %s599_s0 = inlined_call_operand.hbm [shape: f32[2,4,256], index: 0, kind: input, shape index: {}]   ;;  %s600_s1 = inlined_call_operand.vmem [shape: f32[2,4,1], index: 1, kind: output, shape index: {0}]   ;;  %s601_s2 = inlined_call_operand.vmem [shape: f32[2,4,1], index: 2, kind: output, shape index: {1}]  }
   0x1   :  { %10 = vsyncpa [#allocation3 + $0x1], 0  ;;  %s504_s9 = smov 0   ;;  %s506_s10 = smov 0  }
   0x2   :  { %s508_s11 = smov 0   ;;  %s510_s12 = smov 0  }
   0x3   :  { %s512_s13 = smov 0   ;;  %s514_s14 = smov 0  }
   0x4 LB: > { %s336_s15 = sadd.s32 4294967295, %s486_s14   ;;  %s28_s16 = sadd.s32 1, %s482_s13  ;;  %s486_s14 = sphi %s514_s14, %s16_s14   ;;  %s482_s13 = sphi %s512_s13, %s608_s13   ;;  %s478_s12 = sphi %s510_s12, %s607_s12   ;;  %s474_s11 = sphi %s508_s11, %s606_s11   ;;  %s470_s10 = sphi %s506_s10, %s605_s10   ;;  %s466_s9 = sphi %s504_s9, %s604_s9  }
   0x5   : > { %p30_p0 = scmp.ge.s32.totalorder %s28_s16, 2  ;;  %s37_s17 = sadd.s32 1, %s474_s11 }
   0x6   : > { %p44_p1 = scmp.ne.s32.totalorder %s474_s11, %s470_s10  ;;  %p45_p2 = scmp.eq.s32.totalorder %s486_s14, 0 }
   0x7   : > { %s610_s16 = smov (%p30_p0, %s28_s16), 0  ;;  %p50_p4 = scmp.ne.s32.totalorder %s470_s10, %s466_s9 }
   0x8   : > { %p540_p3 = por %p45_p2, %p44_p1  ;;  %s32_s19 = ssub.s32 %s482_s13, %s610_s16 }
   0x9   : > { %p51_p5 = scmp.eq.s32.totalorder %s336_s15, 0  ;;  %p35_p6 = scmp.eq.s32.totalorder %s32_s19, 0 }
   0xa   : > { %p356_p8 = scmp.lt.s32.totalorder %s486_s14, 2  ;;  %s126_s22 = sand.u32 1, %s474_s11  }
   0xb   : > { %p547_p7 = por %p51_p5, %p50_p4  ;;  %s349_s23 = sshll.u32 %s482_s13, 3 }
   0xc   : > { %s553_s21 = scalar_select %p35_p6, %s474_s11, %s37_s17  }
   0xd   : > { %s340_s24 = sshll.u32 %s126_s22, 3  ;;  %s137_s27 = scalar_lea.hbm %s599_s0, %s349_s23 }
   0xe   : > { %s139_s28 = sshll.u32 %s137_s27, 4  ;;  %s130_s29 = scalar_lea.vmem [#allocation2], %s340_s24  ;;  %s140_s28 = int_to_ptr.hbm [resolvable:$true] %s139_s28 }
   0xf   : > { %s141_s30 = sshll.u32 %s130_s29, 4  ;;  %p353_p9 = pnand %p356_p8, %p540_p3  ;;  %s142_s30 = int_to_ptr.vmem [resolvable:$true] %s141_s30 }
  0x10   : > { %p343_p10 = scmp.ge.s32.totalorder %s486_s14, 1  ;;  %p146_p11 = scmp.lt.s32.totalorder %s486_s14, 3 }
  0x11   : > { %s127_s3 = scalar_lea.sflag [#allocation3], %s126_s22 }
  0x12   : > { %355 = dma.hbm_to_vmem [thread:$0]  (!%p353_p9), %s140_s28, 128, %s142_s30, %s127_s3  }
  0x13   : > { %p147_p12 = pnand %p343_p10, %p146_p11 }
  0x14   : > { %s152_s4 = sand.u32 (!%p147_p12), 1, %s470_s10  }
  0x15   : > { %150 = sbr.rel (%p147_p12) target bundleno = 166 (0xa6), region = 24  ;;  %s344_s5 = sshll.u32 (!%p147_p12), %s152_s4, 3 }
  0x16   : > { %s153_s6 = scalar_lea.sflag (!%p147_p12), [#allocation3], %s152_s4  ;;  %s156_s7 = scalar_lea.vmem (!%p147_p12), [#allocation2], %s344_s5 }
  0x1a   : > { %461 = dma.done.wait (%p547_p7), %s153_s6, 128  }
  0x1b   : > { %463 = vsyncadd (%p547_p7), %s153_s6, 4294967168  ;;  %p182_p13 = scmp.lt.s32.totalorder %s478_s12, 1  ;;  %vm194_vm0 = vcmask 3072   ;;  %v488_v0 = vmov 0.0   ;;  %v197_v1 = vld [vmem:[%s156_s7] sm:$0xff]  ;;  %vm205_vm1 = vcmask 1043456  }
  0x1c   : > { %200 = vst [vmem:[#allocation1] ss:$2 sm:$0xff] %v197_v1  ;;  %v215_v2 = vmul.f32 %v197_v1, %v197_v1 }
  0x1d   : > { %s612_s12 = smov (!%p182_p13, %s478_s12), 1 }
  0x1e   : > { %s345_s8 = sshll.u32 %s612_s12, 2 }
  0x1f   : > { %s185_s17 = scalar_lea.vmem %s600_s1, %s345_s8  ;;  %s189_s22 = scalar_lea.vmem %s601_s2, %s345_s8 }
  0x20   : > { %195 = vst.msk [vmem:[%s185_s17] sm:$0xf] %vm194_vm0, %v488_v0 }
  0x21   : > { %196 = vst.msk [vmem:[%s189_s22] sm:$0xf] %vm194_vm0, %v488_v0 }
  0x23   : > { %v201_v3 = vld.sshfl [vmem:[#allocation1] sm:$0xff pattern:$0x75316420]  ;;  %v202_v4 = vld.sshfl [vmem:[#allocation1 + $0x8] sm:$0xff pattern:$0x75316420] }
  0x24   : > { %v206_v5 = vsel %vm205_vm1, %v201_v3, 0.0  ;;  %v207_v6 = vsel %vm205_vm1, %v202_v4, 0.0  ;;  %217 = vst [vmem:[#allocation1] ss:$2 sm:$0xff] %v215_v2 }
  0x25   : > { %v208_v7 = vadd.f32 %v207_v6, %v206_v5 }
  0x27   : > { %209 = vadd.xlane.f32.xlu0 %v208_v7  ;;  %v198_v13 = vld [vmem:[%s185_s17] sm:$0xf] }
  0x28   : > { %v214_v16 = vld [vmem:[%s189_s22] sm:$0xf] }
  0x2b   : > { %v218_v8 = vld.sshfl [vmem:[#allocation1] sm:$0xff pattern:$0x75316420]  ;;  %v219_v9 = vld.sshfl [vmem:[#allocation1 + $0x8] sm:$0xff pattern:$0x75316420] }
  0x2c   : > { %v222_v10 = vsel %vm205_vm1, %v218_v8, 0.0  ;;  %v223_v11 = vsel %vm205_vm1, %v219_v9, 0.0 }
  0x2d   : > { %v224_v12 = vadd.f32 %v223_v11, %v222_v10 }
  0x2f   : > { %225 = vadd.xlane.f32.xlu0 %v224_v12 }
  0x9a   : > { %v210_v14 = vpop.xlane.xlu0 %209 }
  0x9b   : > { %v211_v15 = vadd.f32 %v210_v14, %v198_v13 }
  0x9d   : > { %213 = vst.msk [vmem:[%s185_s17] sm:$0xf] %vm194_vm0, %v211_v15 }
  0xa2   : > { %v226_v17 = vpop.xlane.xlu0 %225 }
  0xa3   : > { %v227_v18 = vadd.f32 %v226_v17, %v214_v16 }
  0xa5   : > { %228 = vst.msk [vmem:[%s189_s22] sm:$0xf] %vm194_vm0, %v227_v18 }
  0xa6 PF: > { %s16_s14 = sadd.s32 1, %s486_s14   ;;  %s604_s9 = smov %s470_s10 }
  0xa7   : > { %p13_p0 = scmp.ge.s32.totalorder %s16_s14, 4   ;;  %s605_s10 = smov %s474_s11 }
  0xa8   : > { %s606_s11 = smov %s553_s21  ;;  %s607_s12 = smov %s482_s13 }
  0xa9   : > { %s608_s13 = smov %s610_s16  ;;  %15 = sbr.rel (!%p13_p0) target bundleno = 4 (0x4), region = 80 }
  0xae   :  { %262 = vsyncpa [#allocation3], 1 }
  0xaf   :  { %264 = vsyncpa [#allocation3 + $0x1], 1 }

</bundles_post_ra>
